<compile_context>
chip_gen: v6e
topology: v6e:2x2x1
jax: 0.10.0
libtpu: 0.0.40
codegen_flags: <defaults>
</compile_context>

<pallas_src>
import functools

import jax
import jax.numpy as jnp
from jax import lax
from jax.experimental import pallas as pl
from jax.experimental.pallas import tpu as pltpu


def _round_up(v, m):
    return ((v + m - 1) // m) * m


def _round_down(v, m):
    return (v // m) * m


def _pool_rows_kernel(x_ref, out_ref, *, inv_hw):
    """Common path: each block holds full rows; reduce over the lane axis."""
    x = x_ref[...]                                   # (tile_r, hw)
    mx = jnp.max(x, axis=-1)                         # exact in input dtype
    sm = jnp.sum(x, axis=-1, dtype=jnp.float32)      # widen inside the reduce
    out_ref[0, :] = mx.astype(out_ref.dtype)
    out_ref[1, :] = (sm * inv_hw).astype(out_ref.dtype)


def _pool_rows_hw_kernel(x_ref, out_ref, max_sc, sum_sc, *,
                         inv_hw, hw, tile_hw, need_mask):
    """Large-H*W path: reduction grid axis (last, 'arbitrary') over H*W."""
    k = pl.program_id(1)

    @pl.when(k == 0)
    def _():
        max_sc[...] = jnp.full_like(max_sc, -jnp.inf)
        sum_sc[...] = jnp.zeros_like(sum_sc)

    x = x_ref[...]                                   # (tile_r, tile_hw)
    if need_mask:
        # Mask lanes past the true spatial extent (ragged last H*W tile).
        col = k * tile_hw + lax.broadcasted_iota(jnp.int32, x.shape, 1)
        valid = col < hw
        x_max = jnp.where(valid, x, jnp.array(-jnp.inf, dtype=x.dtype))
        x_sum = jnp.where(valid, x, jnp.array(0, dtype=x.dtype))
    else:
        x_max = x
        x_sum = x

    max_sc[...] = jnp.maximum(
        max_sc[...],
        jnp.max(x_max, axis=-1, keepdims=True).astype(jnp.float32))
    sum_sc[...] = sum_sc[...] + jnp.sum(
        x_sum, axis=-1, keepdims=True, dtype=jnp.float32)

    @pl.when(k == pl.num_programs(1) - 1)
    def _():
        out_ref[0, :] = max_sc[:, 0].astype(out_ref.dtype)
        out_ref[1, :] = (sum_sc[:, 0] * inv_hw).astype(out_ref.dtype)


def adaptive_concat_pool2d(x, size=None):
    """JAX/Pallas equivalent of AdaptiveConcatPool2d.forward (size=1)."""
    size = size or 1
    # TODO(synk): only size=1 (global pooling) is implemented; general adaptive
    # output sizes need per-window start/stop index arithmetic.
    assert size == 1, "only size=1 (global adaptive pooling) is implemented"

    n, c, h, w = x.shape
    hw = h * w
    rows = n * c
    x2 = x.reshape(rows, hw)

    itemsize = jnp.dtype(x.dtype).itemsize
    hw_lanes = _round_up(hw, 128)          # lane-padded row width in VMEM
    inv_hw = 1.0 / float(hw)

    payload_target = 4 * 1024 * 1024       # real (unpadded) HBM bytes / step
    block_budget = 5 * 1024 * 1024         # lane-padded VMEM per input buffer
                                           # (x2 for double buffering)

    if 128 * hw_lanes * itemsize <= block_budget:
        # ---- Common path: whole rows per block, 1-D grid over row tiles. ----
        tile_r = max(128, _round_down(payload_target // (hw * itemsize), 128))
        tile_r = min(
            tile_r,
            max(128, _round_down(block_budget // (hw_lanes * itemsize), 128)))
        if tile_r >= rows:
            tile_r = rows                  # full extent is always a legal block
        grid = (pl.cdiv(rows, tile_r),)

        pooled = pl.pallas_call(
            functools.partial(_pool_rows_kernel, inv_hw=inv_hw),
            out_shape=jax.ShapeDtypeStruct((2, rows), x.dtype),
            grid=grid,
            in_specs=[pl.BlockSpec((tile_r, hw), lambda i: (i, 0))],
            out_specs=pl.BlockSpec((2, tile_r), lambda i: (0, i)),
            compiler_params=pltpu.CompilerParams(
                dimension_semantics=("parallel",)),
        )(x2)
    else:
        # ---- Large-H*W guard: 2-D grid with a spatial reduction axis. ----
        tile_r = min(512, _round_up(rows, 8))
        if tile_r >= rows:
            tile_r = rows
        elif tile_r % 128 != 0:
            tile_r = 128                   # lane-dense output block constraint
        tile_hw = max(128, _round_down(block_budget // (tile_r * itemsize), 128))
        if tile_hw >= hw:
            tile_hw = hw                   # single spatial tile: full extent
        need_mask = (hw % tile_hw) != 0
        grid = (pl.cdiv(rows, tile_r), pl.cdiv(hw, tile_hw))

        pooled = pl.pallas_call(
            functools.partial(_pool_rows_hw_kernel, inv_hw=inv_hw, hw=hw,
                              tile_hw=tile_hw, need_mask=need_mask),
            out_shape=jax.ShapeDtypeStruct((2, rows), x.dtype),
            grid=grid,
            in_specs=[pl.BlockSpec((tile_r, tile_hw), lambda i, k: (i, k))],
            out_specs=pl.BlockSpec((2, tile_r), lambda i, k: (0, i)),
            scratch_shapes=[pltpu.VMEM((tile_r, 1), jnp.float32),
                            pltpu.VMEM((tile_r, 1), jnp.float32)],
            compiler_params=pltpu.CompilerParams(
                dimension_semantics=("parallel", "arbitrary")),
        )(x2)

    # (2, N*C) -> (N, 2*C, 1, 1): max channels first, then avg (torch.cat order).
    out = pooled.reshape(2, n, c).transpose(1, 0, 2).reshape(n, 2 * c, 1, 1)
    return out


if __name__ == "__main__":
    key = jax.random.PRNGKey(0)
    x = jax.random.normal(key, (2, 4, 16, 16), dtype=jnp.float32)  # NCHW

    out = adaptive_concat_pool2d(x)
    jax.block_until_ready(out)

    ref = jnp.concatenate(
        [jnp.max(x, axis=(2, 3), keepdims=True),
         jnp.mean(x, axis=(2, 3), keepdims=True)], axis=1)
    assert out.shape == (2, 8, 1, 1), out.shape
    assert jnp.allclose(out, ref, atol=1e-5, rtol=1e-5), float(
        jnp.max(jnp.abs(out - ref)))

    # Non-lane-aligned spatial extent (7x7 = 49) with all-negative inputs:
    # verifies that lane padding never leaks zeros into the max reduction.
    x2 = -jnp.abs(jax.random.normal(jax.random.PRNGKey(1), (2, 4, 7, 7),
                                    dtype=jnp.float32)) - 1.0
    out2 = adaptive_concat_pool2d(x2)
    jax.block_until_ready(out2)
    ref2 = jnp.concatenate(
        [jnp.max(x2, axis=(2, 3), keepdims=True),
         jnp.mean(x2, axis=(2, 3), keepdims=True)], axis=1)
    assert out2.shape == (2, 8, 1, 1), out2.shape
    assert jnp.allclose(out2, ref2, atol=1e-5, rtol=1e-5), float(
        jnp.max(jnp.abs(out2 - ref2)))

    print("KERNEL_OK")
</pallas_src>

<mosaic_0001>
module attributes {stable_mosaic.version = 11 : i64} {
  func.func @_pool_rows_kernel(%arg0: i32, %arg1: memref<8x256xf32, #tpu.memory_space<vmem>>, %arg2: memref<2x8xf32, #tpu.memory_space<vmem>>) attributes {dimension_semantics = [#tpu.dimension_semantics<parallel>], iteration_bounds = array<i64: 1>, scalar_prefetch = 0 : i64, scratch_operands = 0 : i64, tpu.core_type = #tpu.core_type<tc>, window_params = [{transform_indices = @transform_0, window_bounds = array<i64: 8, 256>}, {transform_indices = @transform_1, window_bounds = array<i64: 2, 8>}]} {
    %c0 = arith.constant 0 : index
    %c0_0 = arith.constant 0 : index
    %0 = vector.load %arg1[%c0, %c0_0] : memref<8x256xf32, #tpu.memory_space<vmem>>, vector<8x256xf32>
    %cst = arith.constant dense<0xFF800000> : vector<8xf32>
    %1 = vector.multi_reduction <maximumf>, %0, %cst [1] : vector<8x256xf32> to vector<8xf32>
    %cst_1 = arith.constant dense<0.000000e+00> : vector<8xf32>
    %2 = vector.multi_reduction <add>, %0, %cst_1 [1] : vector<8x256xf32> to vector<8xf32>
    %c0_2 = arith.constant 0 : index
    %c0_3 = arith.constant 0 : index
    %3 = vector.load %arg2[%c0_2, %c0_3] : memref<2x8xf32, #tpu.memory_space<vmem>>, vector<1x8xf32>
    %4 = vector.shape_cast %3 : vector<1x8xf32> to vector<8xf32>
    %5 = vector.shape_cast %1 : vector<8xf32> to vector<1x8xf32>
    tpu.vector_store %arg2[%c0_2, %c0_3], %5 {strides = array<i32>} : memref<2x8xf32, #tpu.memory_space<vmem>>, vector<1x8xf32>,
    %cst_4 = arith.constant 3.906250e-03 : f32
    %6 = vector.broadcast %cst_4 : f32 to vector<8xf32>
    %7 = arith.mulf %2, %6 : vector<8xf32>
    %c1 = arith.constant 1 : index
    %c0_5 = arith.constant 0 : index
    %8 = vector.load %arg2[%c1, %c0_5] : memref<2x8xf32, #tpu.memory_space<vmem>>, vector<1x8xf32>
    %9 = vector.shape_cast %8 : vector<1x8xf32> to vector<8xf32>
    %10 = vector.shape_cast %7 : vector<8xf32> to vector<1x8xf32>
    tpu.vector_store %arg2[%c1, %c0_5], %10 {strides = array<i32>} : memref<2x8xf32, #tpu.memory_space<vmem>>, vector<1x8xf32>,
    return
  }
  func.func @transform_0(%arg0: i32) -> (i32, i32) {
    %c0_i32 = arith.constant 0 : i32
    %c0_i32_0 = arith.constant 0 : i32
    return %arg0, %c0_i32 : i32, i32
  }
  func.func @transform_1(%arg0: i32) -> (i32, i32) {
    %c0_i32 = arith.constant 0 : i32
    %c0_i32_0 = arith.constant 0 : i32
    return %c0_i32, %arg0 : i32, i32
  }
}

</mosaic_0001>

<bundles_post_ra>
// kernel: tpu_custom_call.1
= control target key start
LH: loop header
LB: loop body
LE: loop exit
PB: predicated region body
PF: predicated region fallthrough
CT: control target
= control target key end

     0   :  { %6 = vsyncpa [#allocation3], 0  ;;  %s126_s0 = inlined_call_operand.hbm [shape: f32[8,256], index: 0, kind: input, shape index: {}]   ;;  %s127_s1 = inlined_call_operand.hbm [shape: f32[2,8], index: 1, kind: output, shape index: {}]  }
   0x1   :  { %7 = vsyncpa [#allocation4], 0  ;;  %s108_s6 = smov [#allocation2]  }
   0x2   :  { %s14_s7 = sshll.u32 %s108_s6, 4  ;;  %s15_s7 = int_to_ptr.vmem [resolvable:$true] %s14_s7 }
   0x3   :  { %s72_s8 = scalar_lea.vmem %s15_s7, 256  ;;  %p77_p1 = scmp.lt.s32.totalorder %s15_s7, %s15_s7 }
   0x4   :  { %p73_p0 = scmp.ne.s32.totalorder %s15_s7, %s72_s8  ;;  %p78_p2 = scmp.lt.s32.totalorder %s72_s8, %s72_s8 }
   0x6   :  { %p79_p3 = por %p78_p2, %p77_p1 }
   0x8   :  { %p80_p4 = pnand %p79_p3, %p73_p0 }
   0xa   :  { %83 = shalt.err (!%p80_p4)
}
   0xb   :  { %17 = dma.hbm_to_vmem [thread:$0]  %s126_s0, 256, %s15_s7, [#allocation3]  }
   0xc   :  { %104 = dma.done.wait [#allocation3], 256  }
   0xd   :  { %105 = vsyncadd [#allocation3], 4294967040  ;;  %v21_v0 = vld [vmem:[#allocation2] sm:$0xff]  ;;  %v22_v1 = vld [vmem:[#allocation2 + $0x8] sm:$0xff]  ;;  %v30_v4 = vlaneseq  ;;  %vm37_vm0 = vcmask 57344   ;;  %s109_s11 = smov [#allocation5]  }
   0xe   :  { %v26_v2 = vadd.f32 %v22_v1, %v21_v0  ;;  %v23_v3 = vmax.f32 %v21_v0, %v22_v1  ;;  %s53_s12 = sshll.u32 %s109_s11, 4  ;;  %s54_s12 = int_to_ptr.vmem [resolvable:$true] %s53_s12 }
   0xf   :  { %v31_v5 = vand.u32 127, %v30_v4  ;;  %v33_v6 = vshrl.u32 %v30_v4, 7  ;;  %s84_s0 = scalar_lea.vmem %s54_s12, 32  ;;  %p89_p6 = scmp.lt.s32.totalorder %s54_s12, %s54_s12 }
  0x10   :  { %27 = vadd.xlane.f32.xlu0 %v26_v2  ;;  %p85_p5 = scmp.ne.s32.totalorder %s54_s12, %s84_s0  ;;  %p90_p7 = scmp.lt.s32.totalorder %s84_s0, %s84_s0 }
  0x11   :  { %v34_v7 = vsub.s32 %v31_v5, %v33_v6 }
  0x12   :  { %p91_p8 = por %p90_p7, %p89_p6 }
  0x14   :  { %24 = vmax.xlane.f32.xlu0 %v23_v3  ;;  %p92_p9 = pnand %p91_p8, %p85_p5 }
  0x99   :  { %v28_v8 = vpop.xlane.xlu0 %27 }
  0x9a   :  { %v39_v9 = vmul.f32 0.00390625, %v28_v8 }
  0x9c   :  { %v44_v10 = vrot.slane %v39_v9, %v34_v7 }
  0x9d   :  { %v25_v11 = vpop.xlane.xlu0 %24 }
  0x9e   :  { %v35_v12 = vrot.slane %v25_v11, %v34_v7  ;;  %46 = vst.msk [vmem:[#allocation5 + $0x1] sm:$0x1] %vm37_vm0, %v44_v10 }
  0xa0   :  { %38 = vst.msk [vmem:[#allocation5] sm:$0x1] %vm37_vm0, %v35_v12 }
  0xa1   :  { %95 = shalt.err (!%p92_p9)
}
  0xa2   :  { %56 = dma.vmem_to_hbm [thread:$0]  %s54_s12, 32, %s127_s1, [#allocation4]  }
  0xa3   :  { %106 = dma.done.wait [#allocation4], 32  }
  0xa4   :  { %107 = vsyncadd [#allocation4], 4294967264 }
  0xa5   :  { %60 = vsyncpa [#allocation3], 1 }
  0xa6   :  { %61 = vsyncpa [#allocation4], 1 }

</bundles_post_ra>
